<compile_context>
chip_gen: v6e
topology: v6e:2x2x1
jax: 0.10.0
libtpu: 0.0.40
codegen_flags: <defaults>
</compile_context>

<pallas_src>
import jax
import jax.numpy as jnp
from jax.experimental import pallas as pl
from jax.experimental.pallas import tpu as pltpu

_BN_EPS = 1e-5
_VMEM_LIMIT = 32 * 1024 * 1024  # safe scoped-VMEM ceiling on v5e/v6e/v7x


def _pick_tile_hw(c, hw):
    """Lane tile along H*W: lane-dense (multiple of 128) and VMEM-safe."""
    if hw % 128 != 0:
        return hw  # full-extent last dim (small / odd spatial sizes)
    # Cap so a (1, C, T) f32 block stays <= ~2 MiB (comfortable with
    # double-buffered in+out blocks even on v7x's 64 MiB VMEM).
    cap = max(128, ((2 * 1024 * 1024) // (4 * c)) // 128 * 128)
    return min(hw, 2048, cap)


def _make_stats_kernel(hw, tile):
    needs_mask = (hw % tile) != 0

    def kernel(x_ref, sum_ref, sq_ref):
        k = pl.program_id(1)

        @pl.when(k == 0)
        def _():
            sum_ref[...] = jnp.zeros_like(sum_ref)
            sq_ref[...] = jnp.zeros_like(sq_ref)

        x = x_ref[...]  # (1, C, T)
        if needs_mask:
            lane = jax.lax.broadcasted_iota(jnp.int32, x.shape, 2) + k * tile
            x = jnp.where(lane < hw, x, 0.0)
        sum_ref[...] += jnp.sum(x, axis=2, keepdims=True)
        sq_ref[...] += jnp.sum(x * x, axis=2, keepdims=True)

    return kernel


def _norm_relu_kernel(x_ref, scale_ref, bias_ref, o_ref):
    # Folded affine: one FMA per element, then ReLU. scale/bias broadcast along lanes.
    y = x_ref[...] * scale_ref[...] + bias_ref[...]
    o_ref[...] = jnp.maximum(y, 0.0)


def base_block_forward(x_nchw, gamma, beta):
    """x_nchw: (N, C, H, W) float32; gamma, beta: (C,) float32."""
    n, c, h, w = x_nchw.shape
    hw = h * w
    x3 = x_nchw.reshape(n, c, hw).astype(jnp.float32)  # free reshape, no transpose

    tile = _pick_tile_hw(c, hw)
    n_hw = (hw + tile - 1) // tile

    # ---- pass 1: per-(n, c) sum and sum-of-squares over H*W tiles ----
    sum_p, sq_p = pl.pallas_call(
        _make_stats_kernel(hw, tile),
        out_shape=(jax.ShapeDtypeStruct((n, c, 1), jnp.float32),
                   jax.ShapeDtypeStruct((n, c, 1), jnp.float32)),
        grid=(n, n_hw),
        in_specs=[pl.BlockSpec((1, c, tile), lambda i, k: (i, 0, k))],
        out_specs=(pl.BlockSpec((1, c, 1), lambda i, k: (i, 0, 0)),
                   pl.BlockSpec((1, c, 1), lambda i, k: (i, 0, 0))),
        compiler_params=pltpu.CompilerParams(
            dimension_semantics=("parallel", "arbitrary"),
            vmem_limit_bytes=_VMEM_LIMIT),
    )(x3)

    # ---- fold statistics into per-channel scale/bias (tiny: C elements) ----
    # Note: E[x^2]-mean^2 in f32 with clamping; validated against reference.
    m_total = float(n * hw)
    sum_c = jnp.sum(sum_p, axis=0)                      # (C, 1)
    sq_c = jnp.sum(sq_p, axis=0)                        # (C, 1)
    mean = sum_c / m_total
    var = jnp.maximum(sq_c / m_total - mean * mean, 0.0)
    inv_std = jax.lax.rsqrt(var + _BN_EPS)
    scale = gamma.reshape(c, 1).astype(jnp.float32) * inv_std
    bias = beta.reshape(c, 1).astype(jnp.float32) - mean * scale
    scale3 = scale.reshape(1, c, 1)
    bias3 = bias.reshape(1, c, 1)

    # ---- pass 2: streaming normalize (FMA) + ReLU ----
    out3 = pl.pallas_call(
        _norm_relu_kernel,
        out_shape=jax.ShapeDtypeStruct((n, c, hw), jnp.float32),
        grid=(n, n_hw),
        in_specs=[pl.BlockSpec((1, c, tile), lambda i, k: (i, 0, k)),
                  pl.BlockSpec((1, c, 1), lambda i, k: (0, 0, 0)),
                  pl.BlockSpec((1, c, 1), lambda i, k: (0, 0, 0))],
        out_specs=pl.BlockSpec((1, c, tile), lambda i, k: (i, 0, k)),
        compiler_params=pltpu.CompilerParams(
            dimension_semantics=("parallel", "parallel"),
            vmem_limit_bytes=_VMEM_LIMIT),
    )(x3, scale3, bias3)

    return out3.reshape(n, c, h, w)


def _reference(x_nchw, gamma, beta):
    """Pure-JAX reference: training-mode BN (biased var) + ReLU."""
    mean = jnp.mean(x_nchw, axis=(0, 2, 3), keepdims=True)
    var = jnp.mean((x_nchw - mean) ** 2, axis=(0, 2, 3), keepdims=True)
    y = (x_nchw - mean) / jnp.sqrt(var + _BN_EPS)
    y = y * gamma.reshape(1, -1, 1, 1) + beta.reshape(1, -1, 1, 1)
    return jnp.maximum(y, 0.0)


if __name__ == "__main__":
    # Small shapes consistent with a conv block: N=2, C_out=4, H=W=16.
    N, C, H, W = 2, 4, 16, 16
    key = jax.random.PRNGKey(0)
    x = jax.random.normal(key, (N, C, H, W), dtype=jnp.float32)

    # Deterministic BatchNorm2d affine parameters.
    gamma = 1.0 + 0.1 * jnp.arange(C, dtype=jnp.float32)
    beta = 0.01 * jnp.arange(C, dtype=jnp.float32)

    out = base_block_forward(x, gamma, beta)
    out = jax.block_until_ready(out)

    ref = _reference(x, gamma, beta)
    assert out.shape == (N, C, H, W)
    assert jnp.max(jnp.abs(out - ref)) < 1e-4

    print("KERNEL_OK")
</pallas_src>

<mosaic_0001>
module attributes {stable_mosaic.version = 11 : i64} {
  func.func @kernel(%arg0: i32, %arg1: i32, %arg2: memref<1x4x256xf32, #tpu.memory_space<vmem>>, %arg3: memref<1x4x1xf32, #tpu.memory_space<vmem>>, %arg4: memref<1x4x1xf32, #tpu.memory_space<vmem>>) attributes {dimension_semantics = [#tpu.dimension_semantics<parallel>, #tpu.dimension_semantics<arbitrary>], iteration_bounds = array<i64: 2, 1>, scalar_prefetch = 0 : i64, scratch_operands = 0 : i64, tpu.core_type = #tpu.core_type<tc>, window_params = [{transform_indices = @transform_0, window_bounds = array<i64: 1, 4, 256>}, {transform_indices = @transform_1, window_bounds = array<i64: 1, 4, 1>}, {transform_indices = @transform_2, window_bounds = array<i64: 1, 4, 1>}]} {
    %c0_i32 = arith.constant 0 : i32
    %0 = arith.cmpi eq, %arg1, %c0_i32 : i32
    %1 = arith.extui %0 : i1 to i32
    %c0_i32_0 = arith.constant 0 : i32
    %2 = arith.cmpi ne, %1, %c0_i32_0 : i32
    scf.if %2 {
      %cst_16 = arith.constant 0.000000e+00 : f32
      %15 = vector.broadcast %cst_16 : f32 to vector<1x4x1xf32>
      %c0_17 = arith.constant 0 : index
      %c0_18 = arith.constant 0 : index
      %c0_19 = arith.constant 0 : index
      %16 = vector.load %arg3[%c0_17, %c0_18, %c0_19] : memref<1x4x1xf32, #tpu.memory_space<vmem>>, vector<1x4x1xf32>
      tpu.vector_store %arg3[%c0_17, %c0_18, %c0_19], %15 {strides = array<i32>} : memref<1x4x1xf32, #tpu.memory_space<vmem>>, vector<1x4x1xf32>,
      %cst_20 = arith.constant 0.000000e+00 : f32
      %17 = vector.broadcast %cst_20 : f32 to vector<1x4x1xf32>
      %c0_21 = arith.constant 0 : index
      %c0_22 = arith.constant 0 : index
      %c0_23 = arith.constant 0 : index
      %18 = vector.load %arg4[%c0_21, %c0_22, %c0_23] : memref<1x4x1xf32, #tpu.memory_space<vmem>>, vector<1x4x1xf32>
      tpu.vector_store %arg4[%c0_21, %c0_22, %c0_23], %17 {strides = array<i32>} : memref<1x4x1xf32, #tpu.memory_space<vmem>>, vector<1x4x1xf32>,
    } else {
    }
    %c0 = arith.constant 0 : index
    %c0_1 = arith.constant 0 : index
    %c0_2 = arith.constant 0 : index
    %3 = vector.load %arg2[%c0, %c0_1, %c0_2] : memref<1x4x256xf32, #tpu.memory_space<vmem>>, vector<1x4x256xf32>
    %c0_3 = arith.constant 0 : index
    %c0_4 = arith.constant 0 : index
    %c0_5 = arith.constant 0 : index
    %4 = vector.load %arg3[%c0_3, %c0_4, %c0_5] : memref<1x4x1xf32, #tpu.memory_space<vmem>>, vector<1x4x1xf32>
    %cst = arith.constant dense<0.000000e+00> : vector<1x4xf32>
    %5 = vector.multi_reduction <add>, %3, %cst [2] : vector<1x4x256xf32> to vector<1x4xf32>
    %6 = vector.shape_cast %5 : vector<1x4xf32> to vector<1x4x1xf32>
    %7 = arith.addf %4, %6 : vector<1x4x1xf32>
    %c0_6 = arith.constant 0 : index
    %c0_7 = arith.constant 0 : index
    %c0_8 = arith.constant 0 : index
    %8 = vector.load %arg3[%c0_6, %c0_7, %c0_8] : memref<1x4x1xf32, #tpu.memory_space<vmem>>, vector<1x4x1xf32>
    tpu.vector_store %arg3[%c0_6, %c0_7, %c0_8], %7 {strides = array<i32>} : memref<1x4x1xf32, #tpu.memory_space<vmem>>, vector<1x4x1xf32>,
    %c0_9 = arith.constant 0 : index
    %c0_10 = arith.constant 0 : index
    %c0_11 = arith.constant 0 : index
    %9 = vector.load %arg4[%c0_9, %c0_10, %c0_11] : memref<1x4x1xf32, #tpu.memory_space<vmem>>, vector<1x4x1xf32>
    %10 = arith.mulf %3, %3 : vector<1x4x256xf32>
    %cst_12 = arith.constant dense<0.000000e+00> : vector<1x4xf32>
    %11 = vector.multi_reduction <add>, %10, %cst_12 [2] : vector<1x4x256xf32> to vector<1x4xf32>
    %12 = vector.shape_cast %11 : vector<1x4xf32> to vector<1x4x1xf32>
    %13 = arith.addf %9, %12 : vector<1x4x1xf32>
    %c0_13 = arith.constant 0 : index
    %c0_14 = arith.constant 0 : index
    %c0_15 = arith.constant 0 : index
    %14 = vector.load %arg4[%c0_13, %c0_14, %c0_15] : memref<1x4x1xf32, #tpu.memory_space<vmem>>, vector<1x4x1xf32>
    tpu.vector_store %arg4[%c0_13, %c0_14, %c0_15], %13 {strides = array<i32>} : memref<1x4x1xf32, #tpu.memory_space<vmem>>, vector<1x4x1xf32>,
    return
  }
  func.func @transform_0(%arg0: i32, %arg1: i32) -> (i32, i32, i32) {
    %c0_i32 = arith.constant 0 : i32
    %c0_i32_0 = arith.constant 0 : i32
    return %arg0, %c0_i32, %arg1 : i32, i32, i32
  }
  func.func @transform_1(%arg0: i32, %arg1: i32) -> (i32, i32, i32) {
    %c0_i32 = arith.constant 0 : i32
    %c0_i32_0 = arith.constant 0 : i32
    %c0_i32_1 = arith.constant 0 : i32
    return %arg0, %c0_i32, %c0_i32_0 : i32, i32, i32
  }
  func.func @transform_2(%arg0: i32, %arg1: i32) -> (i32, i32, i32) {
    %c0_i32 = arith.constant 0 : i32
    %c0_i32_0 = arith.constant 0 : i32
    %c0_i32_1 = arith.constant 0 : i32
    return %arg0, %c0_i32, %c0_i32_0 : i32, i32, i32
  }
}

</mosaic_0001>

<bundles_post_ra>
// kernel: tpu_custom_call.1
= control target key start
LH: loop header
LB: loop body
LE: loop exit
PB: predicated region body
PF: predicated region fallthrough
CT: control target
= control target key end

     0   :  { %8 = vsyncpa [#allocation3], 0  ;;  %s603_s0 = inlined_call_operand.hbm [shape: f32[2,4,256], index: 0, kind: input, shape index: {}]   ;;  %s604_s1 = inlined_call_operand.vmem [shape: f32[2,4,1], index: 1, kind: output, shape index: {0}]   ;;  %s605_s2 = inlined_call_operand.vmem [shape: f32[2,4,1], index: 2, kind: output, shape index: {1}]  }
   0x1   :  { %10 = vsyncpa [#allocation3 + $0x1], 0  ;;  %s496_s9 = smov 0   ;;  %s498_s10 = smov 0  }
   0x2   :  { %s500_s11 = smov 0   ;;  %s502_s12 = smov 0  }
   0x3   :  { %s504_s13 = smov 0   ;;  %s506_s14 = smov 0  }
   0x4 LB: > { %s328_s15 = sadd.s32 4294967295, %s477_s14   ;;  %s28_s16 = sadd.s32 1, %s473_s13  ;;  %s477_s14 = sphi %s506_s14, %s16_s14   ;;  %s473_s13 = sphi %s504_s13, %s613_s13   ;;  %s469_s12 = sphi %s502_s12, %s612_s12   ;;  %s465_s11 = sphi %s500_s11, %s611_s11   ;;  %s461_s10 = sphi %s498_s10, %s610_s10   ;;  %s457_s9 = sphi %s496_s9, %s609_s9  }
   0x5   : > { %p30_p0 = scmp.ge.s32.totalorder %s28_s16, 2  ;;  %s37_s17 = sadd.s32 1, %s465_s11 }
   0x6   : > { %p44_p1 = scmp.ne.s32.totalorder %s465_s11, %s461_s10  ;;  %p45_p2 = scmp.eq.s32.totalorder %s477_s14, 0 }
   0x7   : > { %s615_s16 = smov (%p30_p0, %s28_s16), 0  ;;  %p50_p4 = scmp.ne.s32.totalorder %s461_s10, %s457_s9 }
   0x8   : > { %p532_p3 = por %p45_p2, %p44_p1  ;;  %s32_s19 = ssub.s32 %s473_s13, %s615_s16 }
   0x9   : > { %p51_p5 = scmp.eq.s32.totalorder %s328_s15, 0  ;;  %p35_p6 = scmp.eq.s32.totalorder %s32_s19, 0 }
   0xa   : > { %p348_p8 = scmp.lt.s32.totalorder %s477_s14, 2  ;;  %s126_s22 = sand.u32 1, %s465_s11  }
   0xb   : > { %p539_p7 = por %p51_p5, %p50_p4  ;;  %s341_s23 = sshll.u32 %s473_s13, 7 }
   0xc   : > { %s545_s21 = scalar_select %p35_p6, %s465_s11, %s37_s17  }
   0xd   : > { %s332_s24 = sshll.u32 %s126_s22, 3  ;;  %s138_s27 = scalar_lea.hbm %s603_s0, %s341_s23 }
   0xe   : > { %s130_s28 = scalar_lea.vmem [#allocation2], %s332_s24  ;;  %p554_p9 = pnand %p348_p8, %p532_p3 }
   0xf   : > { %s140_s29 = sshll.u32 %s130_s28, 4  ;;  %p335_p10 = scmp.ge.s32.totalorder %s477_s14, 1  ;;  %s141_s29 = int_to_ptr.vmem [resolvable:$true] %s140_s29 }
  0x10   : > { %p145_p11 = scmp.lt.s32.totalorder %s477_s14, 3  ;;  %s127_s3 = scalar_lea.sflag [#allocation3], %s126_s22 }
  0x11   : > { %p401_p12 = pneg %p554_p9  ;;  %s412_s4 = scalar_lea.vmem %s141_s29, 128 }
  0x12   : > { %p413_p13 = scmp.ne.s32.totalorder %s141_s29, %s412_s4  ;;  %s479_s5 = smov [#allocation2]  }
  0x13   : > { %s417_s6 = sshll.u32 %s479_s5, 4  ;;  %s418_s6 = int_to_ptr.vmem [resolvable:$false] %s417_s6 }
  0x14   : > { %p415_p0 = pnand %p413_p13, %p401_p12  ;;  %s419_s7 = scalar_lea.vmem %s418_s6, 256 }
  0x15   : > { %p420_p2 = scmp.lt.s32.totalorder %s141_s29, %s418_s6  ;;  %p421_p3 = scmp.lt.s32.totalorder %s419_s7, %s412_s4 }
  0x16   : > { %p416_p1 = pneg %p415_p0 }
  0x17   : > { %p422_p4 = por %p421_p3, %p420_p2 }
  0x19   : > { %p423_p5 = pnand %p422_p4, %p416_p1 }
  0x1b   : > { %426 = shalt.err (!%p423_p5)
}
  0x1c   : > { %347 = dma.hbm_to_vmem [thread:$0]  (!%p554_p9), %s138_s27, 128, %s141_s29, %s127_s3  }
  0x1d   : > { %p146_p6 = pnand %p335_p10, %p145_p11 }
  0x1e   : > { %s151_s8 = sand.u32 (!%p146_p6), 1, %s461_s10  }
  0x1f   : > { %149 = sbr.rel (%p146_p6) target bundleno = 188 (0xbc), region = 24  ;;  %s336_s9 = sshll.u32 (!%p146_p6), %s151_s8, 3 }
  0x20   : > { %s152_s15 = scalar_lea.sflag (!%p146_p6), [#allocation3], %s151_s8  ;;  %s155_s17 = scalar_lea.vmem (!%p146_p6), [#allocation2], %s336_s9 }
  0x24   : > { %452 = dma.done.wait (%p539_p7), %s152_s15, 128  }
  0x25   : > { %454 = vsyncadd (%p539_p7), %s152_s15, 4294967168  ;;  %p180_p8 = scmp.lt.s32.totalorder %s469_s12, 1  ;;  %vm192_vm0 = vcmask 3072   ;;  %vm200_vm1 = vcmask 1043456   ;;  %v480_v0 = vmov 0.0   ;;  %v195_v1 = vld [vmem:[%s155_s17] sm:$0xff] }
  0x26   : > { %v198_v2 = vcombine.high %v195_v1, %v195_v1  ;;  %v201_v3 = vsel %vm200_vm1, %v195_v1, 0.0  ;;  %v210_v4 = vmul.f32 %v195_v1, %v195_v1 }
  0x27   : > { %s617_s12 = smov (!%p180_p8, %s469_s12), 1 }
  0x28   : > { %s337_s18 = sshll.u32 %s617_s12, 2  ;;  %v202_v5 = vsel %vm200_vm1, %v198_v2, 0.0  ;;  %v212_v6 = vcombine.high %v210_v4, %v210_v4  ;;  %v214_v7 = vsel %vm200_vm1, %v210_v4, 0.0 }
  0x29   : > { %s183_s23 = scalar_lea.vmem %s604_s1, %s337_s18  ;;  %v203_v8 = vadd.f32 %v202_v5, %v201_v3  ;;  %s187_s24 = scalar_lea.vmem %s605_s2, %s337_s18 }
  0x2a   : > { %193 = vst.msk [vmem:[%s183_s23] sm:$0xf] %vm192_vm0, %v480_v0  ;;  %v215_v9 = vsel %vm200_vm1, %v212_v6, 0.0  ;;  %194 = vst.msk [vmem:[%s187_s24] sm:$0xf] %vm192_vm0, %v480_v0 }
  0x2b   : > { %204 = vadd.xlane.f32.xlu0 %v203_v8  ;;  %v216_v10 = vadd.f32 %v215_v9, %v214_v7 }
  0x2f   : > { %217 = vadd.xlane.f32.xlu0 %v216_v10 }
  0x31   : > { %v196_v11 = vld [vmem:[%s183_s23] sm:$0xf] }
  0x32   : > { %v209_v14 = vld [vmem:[%s187_s24] sm:$0xf] }
  0xb4   : > { %v205_v12 = vpop.xlane.xlu0 %204 }
  0xb5   : > { %v206_v13 = vadd.f32 %v205_v12, %v196_v11 }
  0xb7   : > { %208 = vst.msk [vmem:[%s183_s23] sm:$0xf] %vm192_vm0, %v206_v13 }
  0xb8   : > { %v218_v15 = vpop.xlane.xlu0 %217 }
  0xb9   : > { %v219_v16 = vadd.f32 %v218_v15, %v209_v14 }
  0xbb   : > { %220 = vst.msk [vmem:[%s187_s24] sm:$0xf] %vm192_vm0, %v219_v16 }
  0xbc PF: > { %s16_s14 = sadd.s32 1, %s477_s14   ;;  %s609_s9 = smov %s461_s10 }
  0xbd   : > { %p13_p7 = scmp.ge.s32.totalorder %s16_s14, 4   ;;  %s610_s10 = smov %s465_s11 }
  0xbe   : > { %s611_s11 = smov %s545_s21  ;;  %s612_s12 = smov %s473_s13 }
  0xbf   : > { %s613_s13 = smov %s615_s16  ;;  %15 = sbr.rel (!%p13_p7) target bundleno = 4 (0x4), region = 80 }
  0xc4   :  { %254 = vsyncpa [#allocation3], 1 }
  0xc5   :  { %256 = vsyncpa [#allocation3 + $0x1], 1 }

</bundles_post_ra>
